<compile_context>
chip_gen: v5e
topology: v5e:2x2
jax: 0.10.0
libtpu: 0.0.40
codegen_flags: <defaults>
</compile_context>

<pallas_src>
import jax
import jax.numpy as jnp
from jax import lax
from jax.experimental import pallas as pl
from jax.experimental.pallas import tpu as pltpu


# ----------------------------- banded-weight construction (plain JAX) --------
def _conv_band(wt, w, out_stride, col_off):
    """Banded matrix of a 1xK 'same' conv (zero pad (K-1)//2) on row-flattened data.

    wt: (k, cin, cout) f32 taps.  Returns A of shape (w*cin, w*out_stride) s.t.
    out_flat = in_flat @ A, with in_flat index wi*cin + ci and output columns
    placed at wo*out_stride + col_off + co.  Out-of-range taps are zero rows,
    i.e. exactly PyTorch's zero padding of the conv input.
    """
    k, cin, cout = wt.shape
    p = (k - 1) // 2
    wi = jnp.arange(w)[:, None]
    wo = jnp.arange(w)[None, :]
    d = wi - wo + p                                    # tap index per (wi, wo)
    valid = (d >= 0) & (d < k)
    taps = wt[jnp.clip(d, 0, k - 1)]                   # (w, w, cin, cout)
    band = jnp.where(valid[:, :, None, None], taps, 0.0)
    band = jnp.transpose(band, (0, 2, 1, 3))           # (wi, ci, wo, co)
    band = band.reshape(w * cin, w, cout)
    placed = jnp.zeros((w * cin, w, out_stride), band.dtype)
    placed = placed.at[:, :, col_off:col_off + cout].set(band)
    return placed.reshape(w * cin, w * out_stride)


def _tile_bias(b, w, out_stride, col_off):
    v = jnp.zeros((w, out_stride), b.dtype)
    v = v.at[:, col_off:col_off + b.shape[0]].set(jnp.broadcast_to(b, (w, b.shape[0])))
    return v.reshape(w * out_stride)


# ----------------------------------- kernel ----------------------------------
def _inception_kernel(x_ref, a_ref, b_ref, o_ref):
    """One MXU matmul (bf16 operands, f32 accumulation) + f32 bias + dense store."""
    o_ref[...] = (jnp.dot(x_ref[...], a_ref[...],
                          preferred_element_type=jnp.float32)
                  + b_ref[...]).astype(o_ref.dtype)


# ----------------------------------- helpers ---------------------------------
def _round_up(v, mult):
    return ((v + mult - 1) // mult) * mult


def _round_down(v, mult):
    return (v // mult) * mult


def _choose_tm(m, cap):
    """Row-tile size: >=16 rows (bf16 sublane pack), MXU-pass aligned (128/256)
    when large, aiming for an even grid of >=2..4 steps (v7x has 2 TensorCores
    and the pipeline needs >1 step per core).  Rows get padded, so no divisor
    search is needed."""
    cap = max(16, _round_down(cap, 16))
    if m >= 4 * 256:
        tm = min(cap, max(256, _round_down(m // 4, 256)))
    elif m >= 4 * 16:
        tm = min(cap, max(16, _round_down(m // 4, 16)))
    elif m > 16:
        tm = min(cap, 16)            # 2 small steps beat one un-pipelined step
    else:
        tm = 16
    if tm >= 256:
        tm = _round_down(tm, 256)
    elif tm >= 128:
        tm = _round_down(tm, 128)
    steps = pl.cdiv(m, tm)
    if steps > 1 and steps % 2 == 1:      # prefer an even step count (2 TCs)
        tm_alt = max(16, _round_down(pl.cdiv(m, steps + 1), 16))
        if pl.cdiv(m, tm_alt) % 2 == 0:
            tm = tm_alt
    return tm


def _spec(shape, index_map, single_buffer=False):
    """BlockSpec; grid-invariant weight blocks are single-buffered when possible."""
    if single_buffer and hasattr(pl, "Buffered"):
        try:
            return pl.BlockSpec(shape, index_map, pipeline_mode=pl.Buffered(1))
        except TypeError:
            pass
    return pl.BlockSpec(shape, index_map)


# ----------------------------------- wrapper ---------------------------------
def inception_block_pallas(x_nchw, params, k1, k2, k3, tm_cap=1024):
    assert k1 % 2 == 1 and k2 % 2 == 1 and k3 % 2 == 1, "odd kernels keep width W"
    n, cin, h, w = x_nchw.shape
    out_c = params["w11"].shape[-1]
    out_ch = 4 * out_c
    m = n * h
    cm = w * cin           # flattened width of one input row
    co = w * out_ch        # flattened width of one output row

    f32 = jnp.float32
    hp = lax.Precision.HIGHEST
    mm = lambda a, b: jnp.dot(a, b, precision=hp)
    g = lambda name: params[name].astype(f32)

    # avg_pool2d(kernel=(1,k2), stride=1, pad, count_include_pad=True) ==
    # a 1xk2 conv with taps I/k2 and no bias.
    w_pool = jnp.tile(jnp.eye(cin, dtype=f32)[None], (k2, 1, 1)) / float(k2)

    # torch.cat order: [branch_pool, branch1_1, branch2_2, branch3_3]
    off_pool, off_b1, off_b2, off_b3 = 0, out_c, 2 * out_c, 3 * out_c

    # ---- fold every (purely linear) branch into one matrix + one bias row ----
    # branch1: conv11
    a_b1 = _conv_band(g("w11"), w, out_ch, off_b1)
    bias = _tile_bias(g("b11"), w, out_ch, off_b1)
    # branch2: conv21 -> conv22
    band22 = _conv_band(g("w22"), w, out_ch, off_b2)
    a_b2 = mm(_conv_band(g("w21"), w, cin, 0), band22)
    bias = (bias + mm(_tile_bias(g("b21"), w, cin, 0), band22)
            + _tile_bias(g("b22"), w, out_ch, off_b2))
    # branch3: conv31 -> conv32 -> conv33
    band32 = _conv_band(g("w32"), w, out_c, 0)
    band33 = _conv_band(g("w33"), w, out_ch, off_b3)
    a_b3 = mm(mm(_conv_band(g("w31"), w, cin, 0), band32), band33)
    bias = (bias
            + mm(mm(_tile_bias(g("b31"), w, cin, 0), band32)
                 + _tile_bias(g("b32"), w, out_c, 0), band33)
            + _tile_bias(g("b33"), w, out_ch, off_b3))
    # pool branch: avg_pool -> conv_pool (the pool itself has no bias)
    a_bp = mm(_conv_band(w_pool, w, cin, 0),
              _conv_band(g("wp"), w, out_ch, off_pool))
    bias = bias + _tile_bias(g("bp"), w, out_ch, off_pool)

    # Branches occupy disjoint output-column slices, so the sum IS the concat.
    a_full = a_b1 + a_b2 + a_b3 + a_bp                       # (cm, co) f32

    # NCHW -> lane-dense, row-flattened (M, W*Cin) bf16 MXU operand.
    x_rows = jnp.transpose(x_nchw, (0, 2, 3, 1)).reshape(m, cm).astype(jnp.bfloat16)

    # ---- per-generation VMEM budget ----
    try:
        vmem_cap = int(pltpu.get_tpu_info().vmem_capacity_bytes)
    except Exception:
        vmem_cap = 64 * 1024 * 1024            # conservative (v7x per-TC VMEM)
    vmem_limit = min(int(vmem_cap * 3 // 4), 96 * 1024 * 1024)

    lane_cm = _round_up(cm, 128)

    def _row_bytes(tn):
        return (2 * lane_cm * 2        # x tile, bf16, double-buffered
                + 2 * tn * 4           # output tile, f32, double-buffered
                + 2 * tn * 4)          # matmul result / store staging, f32

    def _weight_bytes(tn, bufs):
        return bufs * (cm * tn * 2     # banded-matrix block, bf16
                       + 8 * tn * 4)   # bias block (sublane-padded), f32

    # Output-column tiling: shrink tn (multiples of 128) until the weights plus
    # a minimal 16-row pipeline fit -> graceful degradation instead of VMEM OOM.
    tn = _round_up(co, 128)
    while tn > 128 and _weight_bytes(tn, 2) + 16 * _row_bytes(tn) > vmem_limit:
        tn -= 128
    n_steps = pl.cdiv(co, tn)
    co_pad = n_steps * tn
    single_buf_w = (n_steps == 1)      # weights grid-invariant -> single-buffer
    wbytes = _weight_bytes(tn, 1 if single_buf_w else 2)
    if wbytes + 16 * _row_bytes(tn) > vmem_limit:
        # TODO(synk): tap-loop fallback for very large W*Cin.
        raise NotImplementedError("banded InceptionBlock weights do not fit VMEM")

    budget = vmem_limit - wbytes - (2 << 20)          # headroom for mosaic scratch
    tm_vmem = max(16, _round_down(max(budget, 0) // _row_bytes(tn), 16))
    tm = _choose_tm(m, min(tm_cap, tm_vmem))
    m_steps = pl.cdiv(m, tm)
    m_pad = m_steps * tm

    # Pad rows / output columns so every block is full (pad is zero, sliced off).
    if m_pad != m:
        x_rows = jnp.pad(x_rows, ((0, m_pad - m), (0, 0)))
    if co_pad != co:
        a_full = jnp.pad(a_full, ((0, 0), (0, co_pad - co)))
        bias = jnp.pad(bias, ((0, co_pad - co),))
    a_bf = a_full.astype(jnp.bfloat16)
    bias2d = bias[None, :]                                   # (1, co_pad) f32

    out_rows = pl.pallas_call(
        _inception_kernel,
        out_shape=jax.ShapeDtypeStruct((m_pad, co_pad), jnp.float32),
        grid=(m_steps, n_steps),
        in_specs=[pl.BlockSpec((tm, cm), lambda i, j: (i, 0)),
                  _spec((cm, tn), lambda i, j: (0, j), single_buffer=single_buf_w),
                  _spec((1, tn), lambda i, j: (0, j), single_buffer=single_buf_w)],
        out_specs=pl.BlockSpec((tm, tn), lambda i, j: (i, j)),
        compiler_params=pltpu.CompilerParams(
            dimension_semantics=("parallel", "parallel"),
            vmem_limit_bytes=vmem_limit),
    )(x_rows, a_bf, bias2d)

    out_rows = out_rows[:m, :co]
    # (M, W*out_ch) -> NCHW
    return jnp.transpose(out_rows.reshape(n, h, w, out_ch), (0, 3, 1, 2))


# ---------------- pure-JAX reference (NCHW, matches PyTorch semantics) -------
def _conv_ref(x, w_kic, b, k):
    w_oihw = jnp.transpose(w_kic, (2, 1, 0))[:, :, None, :]   # (Cout, Cin, 1, k)
    p = (k - 1) // 2
    y = lax.conv_general_dilated(
        x, w_oihw, window_strides=(1, 1), padding=((0, 0), (p, p)),
        dimension_numbers=("NCHW", "OIHW", "NCHW"),
        precision=lax.Precision.HIGHEST)
    return y + b[None, :, None, None]


def _avg_pool_ref(x, k):
    p = (k - 1) // 2
    s = lax.reduce_window(x, 0.0, lax.add, (1, 1, 1, k), (1, 1, 1, 1),
                          padding=((0, 0), (0, 0), (0, 0), (p, p)))
    return s / k    # count_include_pad=True (PyTorch default)


def inception_ref(x, params, k1, k2, k3):
    br1 = _conv_ref(x, params["w11"], params["b11"], k1)
    br2 = _conv_ref(x, params["w21"], params["b21"], k1)
    br2 = _conv_ref(br2, params["w22"], params["b22"], k3)
    br3 = _conv_ref(x, params["w31"], params["b31"], k1)
    br3 = _conv_ref(br3, params["w32"], params["b32"], k2)
    br3 = _conv_ref(br3, params["w33"], params["b33"], k2)
    brp = _avg_pool_ref(x, k2)
    brp = _conv_ref(brp, params["wp"], params["bp"], k1)
    return jnp.concatenate([brp, br1, br2, br3], axis=1)


if __name__ == "__main__":
    N, IN_CH, H, W = 2, 4, 16, 16
    OUT_CH = 8
    K1, K2, K3 = 1, 3, 5      # odd kernels keep width W (typical Inception use)
    OUT = OUT_CH // 4

    shapes = {
        "w11": (K1, IN_CH, OUT), "b11": (OUT,),
        "w21": (K1, IN_CH, IN_CH), "b21": (IN_CH,),
        "w22": (K3, IN_CH, OUT), "b22": (OUT,),
        "w31": (K1, IN_CH, IN_CH), "b31": (IN_CH,),
        "w32": (K2, IN_CH, OUT), "b32": (OUT,),
        "w33": (K2, OUT, OUT), "b33": (OUT,),
        "wp": (K1, IN_CH, OUT), "bp": (OUT,),
    }

    key = jax.random.PRNGKey(0)
    keys = jax.random.split(key, len(shapes) + 1)
    params = {}
    for i, (name, shp) in enumerate(shapes.items()):
        if name.startswith("w"):
            fan_in = shp[0] * shp[1]
        else:
            wshp = shapes["w" + name[1:]]
            fan_in = wshp[0] * wshp[1]
        bound = 1.0 / (fan_in ** 0.5)    # PyTorch default uniform init range
        params[name] = jax.random.uniform(keys[i], shp, jnp.float32, -bound, bound)

    x = jax.random.normal(keys[-1], (N, IN_CH, H, W), jnp.float32)

    out = inception_block_pallas(x, params, K1, K2, K3)
    out = jax.block_until_ready(out)
    assert out.shape == (N, OUT_CH, H, W), out.shape

    # Full-precision reference; the only kernel-side deltas are the bf16
    # rounding of x and of the composed banded weights (f32 MXU accumulation).
    ref = inception_ref(x, params, K1, K2, K3)
    max_err = float(jnp.max(jnp.abs(out - ref)))
    if max_err > 3e-2:
        raise AssertionError(f"Pallas kernel mismatch vs reference: max_err={max_err}")

    print("KERNEL_OK")
</pallas_src>

<mosaic_0001>
module attributes {stable_mosaic.version = 11 : i64} {
  func.func @_inception_kernel(%arg0: i32, %arg1: i32, %arg2: memref<16x64xbf16, #tpu.memory_space<vmem>>, %arg3: memref<64x128xbf16, #tpu.memory_space<vmem>>, %arg4: memref<1x128xf32, #tpu.memory_space<vmem>>, %arg5: memref<16x128xf32, #tpu.memory_space<vmem>>) attributes {dimension_semantics = [#tpu.dimension_semantics<parallel>, #tpu.dimension_semantics<parallel>], iteration_bounds = array<i64: 2, 1>, scalar_prefetch = 0 : i64, scratch_operands = 0 : i64, tpu.core_type = #tpu.core_type<tc>, window_params = [{transform_indices = @transform_0, window_bounds = array<i64: 16, 64>}, {pipeline_mode = #tpu.pipeline_mode<synchronous>, transform_indices = @transform_1, window_bounds = array<i64: 64, 128>}, {pipeline_mode = #tpu.pipeline_mode<synchronous>, transform_indices = @transform_2, window_bounds = array<i64: 1, 128>}, {transform_indices = @transform_3, window_bounds = array<i64: 16, 128>}]} {
    %c0 = arith.constant 0 : index
    %c0_0 = arith.constant 0 : index
    %0 = vector.load %arg2[%c0, %c0_0] : memref<16x64xbf16, #tpu.memory_space<vmem>>, vector<16x64xbf16>
    %c0_1 = arith.constant 0 : index
    %c0_2 = arith.constant 0 : index
    %1 = vector.load %arg3[%c0_1, %c0_2] : memref<64x128xbf16, #tpu.memory_space<vmem>>, vector<64x128xbf16>
    %cst = arith.constant dense<0.000000e+00> : vector<16x128xf32>
    %2 = tpu.matmul %0, %1, %cst {dimension_numbers = #tpu.dot_dimension_numbers<[1], [0], [0], [1], [0, 0, 1, 1], [], []>} : vector<16x64xbf16>, vector<64x128xbf16>, vector<16x128xf32> -> vector<16x128xf32>
    %c0_3 = arith.constant 0 : index
    %c0_4 = arith.constant 0 : index
    %3 = vector.load %arg4[%c0_3, %c0_4] : memref<1x128xf32, #tpu.memory_space<vmem>>, vector<1x128xf32>
    %4 = vector.broadcast %3 : vector<1x128xf32> to vector<16x128xf32>
    %5 = arith.addf %2, %4 : vector<16x128xf32>
    %c0_5 = arith.constant 0 : index
    %c0_6 = arith.constant 0 : index
    %6 = vector.load %arg5[%c0_5, %c0_6] : memref<16x128xf32, #tpu.memory_space<vmem>>, vector<16x128xf32>
    tpu.vector_store %arg5[%c0_5, %c0_6], %5 {strides = array<i32>} : memref<16x128xf32, #tpu.memory_space<vmem>>, vector<16x128xf32>,
    return
  }
  func.func @transform_0(%arg0: i32, %arg1: i32) -> (i32, i32) {
    %c0_i32 = arith.constant 0 : i32
    %c0_i32_0 = arith.constant 0 : i32
    return %arg0, %c0_i32 : i32, i32
  }
  func.func @transform_1(%arg0: i32, %arg1: i32) -> (i32, i32) {
    %c0_i32 = arith.constant 0 : i32
    %c0_i32_0 = arith.constant 0 : i32
    return %c0_i32, %arg1 : i32, i32
  }
  func.func @transform_2(%arg0: i32, %arg1: i32) -> (i32, i32) {
    %c0_i32 = arith.constant 0 : i32
    %c0_i32_0 = arith.constant 0 : i32
    return %c0_i32, %arg1 : i32, i32
  }
  func.func @transform_3(%arg0: i32, %arg1: i32) -> (i32, i32) {
    %c0_i32 = arith.constant 0 : i32
    return %arg0, %arg1 : i32, i32
  }
}

</mosaic_0001>

<bundles_post_ra>
// kernel: tpu_custom_call.1
= control target key start
LH: loop header
LB: loop body
LE: loop exit
PB: predicated region body
PF: predicated region fallthrough
CT: control target
= control target key end

     0   :  { %s889_s0 = inlined_call_operand.hbm [shape: bf16[32,64], index: 0, kind: input, shape index: {}]   ;;  %s890_s1 = inlined_call_operand.hbm [shape: bf16[64,128], index: 1, kind: input, shape index: {}]   ;;  %s891_s2 = inlined_call_operand.vmem [shape: f32[1,128], index: 2, kind: input, shape index: {}]   ;;  %s892_s3 = inlined_call_operand.hbm [shape: f32[32,128], index: 3, kind: output, shape index: {}]  }
   0x1   :  { %894 = sst [smem:[#allocation11_spill]] %s890_s1 }
   0x2   :  { %8 = vsyncpa [#allocation3], 0 }
   0x3   :  { %10 = vsyncpa [#allocation3 + $0x1], 0 }
   0x4   :  { %11 = vsyncpa [#allocation6], 0 }
   0x5   :  { %12 = vsyncpa [#allocation4], 0 }
   0x6   :  { %14 = vsyncpa [#allocation4 + $0x1], 0  ;;  %s730_s12 = smov 0   ;;  %s732_s13 = smov 0  }
   0x7   :  { %s734_s14 = smov 0   ;;  %s736_s15 = smov 0  }
   0x8   :  { %s738_s16 = smov 0   ;;  %s740_s17 = smov 0  }
   0x9 LB: > { %s433_s18 = sadd.s32 4294967295, %s703_s17   ;;  %s434_s19 = sadd.s32 4294967294, %s703_s17   ;;  %s703_s17 = sphi %s740_s17, %s20_s17   ;;  %s699_s16 = sphi %s738_s16, %s908_s16   ;;  %s695_s15 = sphi %s736_s15, %s907_s15   ;;  %s691_s14 = sphi %s734_s14, %s906_s14   ;;  %s687_s13 = sphi %s732_s13, %s905_s13   ;;  %s683_s12 = sphi %s730_s12, %s904_s12  }
   0xa   : > { %p52_p0 = scmp.ne.s32.totalorder %s687_s13, %s683_s12  ;;  %p764_p1 = scmp.eq.s32.totalorder %s433_s18, 0 }
   0xb   : > { %p768_p2 = scmp.eq.s32.totalorder %s433_s18, 1  ;;  %p136_p3 = scmp.eq.s32.totalorder %s434_s19, 1 }
   0xc   : > { %p774_p4 = por %p764_p1, %p52_p0  ;;  %p435_p5 = scmp.ge.s32.totalorder %s703_s17, 1 }
   0xd   : > { %p779_p6 = por %p136_p3, %p52_p0  ;;  %p143_p7 = scmp.lt.s32.totalorder %s703_s17, 3 }
   0xe   : > { %s899_s1 = sld [smem:[#allocation11_spill]]  ;;  %s705_s28 = smov [#allocation5]  }
   0xf   : > { %p787_p8 = pnand %p435_p5, %p143_p7  ;;  %s158_s29 = sshll.u32 %s705_s28, 4  ;;  %s159_s29 = int_to_ptr.vmem [resolvable:$true] %s158_s29 }
  0x10   : > { %p438_p11 = scmp.ge.s32.totalorder %s703_s17, 2  ;;  %s893_s30 = smov 64  }
  0x11   : > { %p487_p9 = pneg %p787_p8  ;;  %s707_s4 = smov 4  }
  0x12   : > { %s32_s5 = sadd.s32 1, %s699_s16  ;;  %s39_s6 = sadd.s32 1, %s691_s14 }
  0x13   : > { %p488_p10 = pnand %p487_p9, %p764_p1  ;;  %p34_p12 = scmp.ge.s32.totalorder %s32_s5, 2 }
  0x14   : > { %s156_s26 = sshll.u32 %s899_s1, 4  ;;  %p46_p13 = scmp.ne.s32.totalorder %s691_s14, %s687_s13  ;;  %s157_s26 = int_to_ptr.hbm [resolvable:$true] %s156_s26 }
  0x15   : > { %490 = dma.hbm_to_vmem [thread:$0]  (!%p488_p10), %s157_s26, 512, %s159_s29, [#allocation6], %s893_s30, %s893_s30, %s707_s4  }
  0x16   : > { %p47_p0 = scmp.eq.s32.totalorder %s703_s17, 0  ;;  %s910_s5 = smov (%p34_p12, %s32_s5), 0 }
  0x17   : > { %p812_p5 = por %p768_p2, %p46_p13  ;;  %s36_s9 = ssub.s32 %s699_s16, %s910_s5 }
  0x18   : > { %p806_p3 = por %p47_p0, %p46_p13  ;;  %p500_p7 = scmp.lt.s32.totalorder %s703_s17, 2 }
  0x19   : > { %p37_p9 = scmp.eq.s32.totalorder %s36_s9, 0  ;;  %s178_s10 = sand.u32 1, %s691_s14  }
  0x1a   : > { %s439_s11 = sshll.u32 %s178_s10, 3  ;;  %s472_s19 = sshll.u32 %s699_s16, 3 }
  0x1b   : > { %s821_s18 = scalar_select %p37_p9, %s691_s14, %s39_s6  }
  0x1c   : > { %s187_s26 = scalar_lea.hbm %s889_s0, %s472_s19  ;;  %s182_s28 = scalar_lea.vmem [#allocation2], %s439_s11 }
  0x1d   : > { %s190_s29 = sshll.u32 %s182_s28, 4  ;;  %s188_s21 = sshll.u32 %s187_s26, 4  ;;  %s191_s29 = int_to_ptr.vmem [resolvable:$true] %s190_s29  ;;  %s189_s21 = int_to_ptr.hbm [resolvable:$true] %s188_s21 }
  0x1e   : > { %p492_p2 = pnand %p500_p7, %p806_p3  ;;  %s179_s30 = scalar_lea.sflag [#allocation3], %s178_s10 }
  0x1f   : > { %s903_s1 = smov 64   ;;  %202 = sbr.rel (%p787_p8) target bundleno = 195 (0xc3), region = 32 }
  0x20   : > { %494 = dma.hbm_to_vmem [thread:$0]  (!%p492_p2), %s189_s21, 128, %s191_s29, %s179_s30, %s903_s1, %s903_s1, %s707_s4  }
  0x21   : > { %s835_s6 = sand.u32 (!%p787_p8), 1, %s687_s13  }
  0x22   : > { %s443_s9 = sshll.u32 (!%p787_p8), %s835_s6, 3  ;;  %s205_s11 = scalar_lea.sflag (!%p787_p8), [#allocation3], %s835_s6 }
  0x23   : > { %s208_s19 = scalar_lea.vmem (!%p787_p8), [#allocation2], %s443_s9 }
  0x24   : > { %670 = dma.done.wait (%p774_p4), %s205_s11, 128  }
  0x25   : > { %672 = vsyncadd (%p774_p4), %s205_s11, 4294967168 }
  0x26   : > { %674 = dma.done.wait (%p764_p1), [#allocation6], 512  }
  0x27   : > { %676 = vsyncadd (%p764_p1), [#allocation6], 4294966784  ;;  %v477_v0 = vld [vmem:[#allocation5 + $0x18] sm:$0xff]  ;;  %v476_v1 = vld [vmem:[#allocation5 + $0x10] sm:$0xff]  ;;  %vm289_vm0 = vcmask 523264   ;;  %s445_s1 = sshll.u32 %s835_s6, 4 }
  0x28   : > { %297 = vmatpush.bf16.msra.mxu0 %v477_v0  ;;  %v475_v2 = vld [vmem:[#allocation5 + $0x8] sm:$0xff]  ;;  %v474_v3 = vld [vmem:[#allocation5] sm:$0xff]  ;;  %v473_v4 = vld [vmem:[%s208_s19] sm:$0xff]  ;;  %s478_s20 = sshll.u32 %s695_s15, 4  ;;  %s239_s10 = scalar_lea.vmem [#allocation7], %s445_s1 }
  0x29   : > { %v556_v5 = vld [vmem:[%s891_s2] ss:$0 sm:$0xff]  ;;  %s322_s7 = scalar_lea.hbm %s892_s3, %s478_s20  ;;  %s323_s24 = sshll.u32 %s239_s10, 4  ;;  %s324_s24 = int_to_ptr.vmem [resolvable:$true] %s323_s24 }
  0x2a   : > { %s325_s25 = sshll.u32 %s322_s7, 4  ;;  %s310_s26 = scalar_lea.sflag [#allocation4], %s835_s6  ;;  %s326_s25 = int_to_ptr.hbm [resolvable:$true] %s325_s25 }
  0x2b   : > { %s631_s28 = sshra.s32 %s326_s25, 4  ;;  %s637_s9 = scalar_lea.hbm %s892_s3, 32  ;;  %s632_s28 = int_to_ptr.hbm [resolvable:$true] %s631_s28 }
  0x2c   : > { %298 = vmatpush.bf16.msra.mxu0 %v476_v1  ;;  %s633_s15 = scalar_lea.hbm %s632_s28, 16  ;;  %p638_p10 = scmp.lt.s32.totalorder %s632_s28, %s892_s3 }
  0x2d   : > { %p634_p1 = scmp.ne.s32.totalorder %s632_s28, %s633_s15  ;;  %p639_p12 = scmp.lt.s32.totalorder %s637_s9, %s633_s15 }
  0x2f   : > { %p635_p4 = pnand %p634_p1, %p812_p5  ;;  %p640_p13 = por %p639_p12, %p638_p10 }
  0x30   : > { %299 = vmatpush.bf16.msra.mxu0 %v475_v2 }
  0x31   : > { %p636_p8 = pneg %p635_p4 }
  0x33   : > { %p641_p0 = pnand %p640_p13, %p636_p8 }
  0x34   : > { %300 = vmatpush.bf16.msra.mxu0 %v474_v3 }
  0x37   : > { %466 = vmatmul.msk.bf16.vlgmr.msra.gmra.mxu0 %vm289_vm0, %v473_v4 }
  0xb4   : > { %v302_v6 = vpop.f32.mrf.mxu0 }
  0xb5   : > { %v303_v7 = vadd.f32 %v556_v5, %v302_v6 }
  0xb7   : > { %307 = vst [vmem:[%s239_s10] sm:$0xff] %v303_v7 }
  0xbc   : > { %v304_v8 = vpop.f32.mrf.mxu0 }
  0xbd   : > { %v305_v9 = vadd.f32 %v556_v5, %v304_v8 }
  0xbf   : > { %308 = vst [vmem:[%s239_s10 + $0x8] sm:$0xff] %v305_v9 }
  0xc0   : > { %644 = shalt.err (!%p641_p0)
}
  0xc1   : > { %s708_s6 = smov 128   ;;  %s709_s1 = smov 8  }
  0xc2   : > { %485 = dma.vmem_to_hbm [thread:$0]  (%p812_p5), %s324_s24, 256, %s326_s25, %s310_s26, %s708_s6, %s708_s6, %s709_s1  }
  0xc3 PF: > { %s340_s22 = sand.u32 1, %s683_s12   ;;  %p496_p3 = pnand %p438_p11, %p779_p6 }
  0xc4   : > { %s341_s27 = scalar_lea.sflag [#allocation4], %s340_s22 }
  0xc5   : > { %p497_p7 = pneg %p496_p3 }
  0xc7   : > { %678 = dma.done.wait (%p497_p7), %s341_s27, 256  }
  0xc8   : > { %680 = vsyncadd (%p497_p7), %s341_s27, 4294967040  ;;  %s20_s17 = sadd.s32 1, %s703_s17   ;;  %s904_s12 = smov %s687_s13 }
  0xc9   : > { %p17_p9 = scmp.ge.s32.totalorder %s20_s17, 4   ;;  %s905_s13 = smov %s691_s14 }
  0xca   : > { %s906_s14 = smov %s821_s18  ;;  %s907_s15 = smov %s699_s16 }
  0xcb   : > { %s908_s16 = smov %s910_s5  ;;  %19 = sbr.rel (!%p17_p9) target bundleno = 9 (0x9), region = 85 }
  0xd0   :  { %347 = vsyncpa [#allocation3], 1 }
  0xd1   :  { %349 = vsyncpa [#allocation3 + $0x1], 1 }
  0xd2   :  { %350 = vsyncpa [#allocation6], 1 }
  0xd3   :  { %351 = vsyncpa [#allocation4], 1 }
  0xd4   :  { %353 = vsyncpa [#allocation4 + $0x1], 1 }

</bundles_post_ra>
